<compile_context>
chip_gen: v7x
topology: tpu7x:2x2x1
jax: 0.10.0
libtpu: 0.0.40
codegen_flags: <defaults>
</compile_context>

<pallas_src>
import functools

import jax
import jax.numpy as jnp
from jax.experimental import pallas as pl
from jax.experimental.pallas import tpu as pltpu

_LANE = 128
_SUB = 8


def _s2w_kernel(coef_ref, inp_ref, out_ref, *, has_z):
    # inp_ref: (C, Rblk, 128) with row 0 = Y = xy[:,0], row 1 = X = xy[:,1],
    # row 2 = z (only when has_z).  All compute is on dense (Rblk, 128) planes.
    Y = inp_ref[0]
    X = inp_ref[1]

    # Batch-invariant scalars, scalar-prefetched into SMEM.
    c0, c1, c2 = coef_ref[0], coef_ref[1], coef_ref[2]
    x0, x1, x2 = coef_ref[3], coef_ref[4], coef_ref[5]
    x3, x4, x5 = coef_ref[6], coef_ref[7], coef_ref[8]
    y0, y1, y2 = coef_ref[9], coef_ref[10], coef_ref[11]
    y3, y4, y5 = coef_ref[12], coef_ref[13], coef_ref[14]
    z0 = coef_ref[15]                      # zero_elevation

    if has_z:
        zz = inp_ref[2] + z0
    else:
        zz = jnp.zeros_like(Y) + z0

    denom = c0 + Y * c1 + X * c2
    # EUP approximate reciprocal (free slot) + one Newton step for fp32-level
    # accuracy; cheaper than a full VALU divide sequence.
    inv = pl.reciprocal(denom, approx=True)
    inv = inv * (2.0 - denom * inv)

    num_x = (x0 + Y * x1 + X * x2) + zz * (x3 + Y * x4 + X * x5)
    # y-negation is folded into the y* coefficients in the wrapper.
    num_y = (y0 + Y * y1 + X * y2) + zz * (y3 + Y * y4 + X * y5)

    # Full-plane, unmasked stores.
    out_ref[0] = num_x * inv
    out_ref[1] = num_y * inv
    out_ref[2] = zz


def screen_to_world(camera_view_matrix, zero_elevation, xy, z=None, *,
                    block_b=131072):
    """Pallas implementation of ScreenToWorld.forward (returns [B, 3])."""
    xy = jnp.asarray(xy, jnp.float32)
    B = xy.shape[0]
    has_z = z is not None

    cam = jnp.asarray(camera_view_matrix, jnp.float32)
    a, b, c, d = cam[0, 0], cam[0, 1], cam[0, 2], cam[0, 3]
    e, f, g, h = cam[1, 0], cam[1, 1], cam[1, 2], cam[1, 3]
    m, n, o, p = cam[3, 0], cam[3, 1], cam[3, 2], cam[3, 3]
    z0 = jnp.asarray(zero_elevation, jnp.float32)

    # 15 batch-invariant coefficients + zero_elevation (O(1) work, SMEM).
    coef = jnp.stack([
        a * f - b * e, a * n - b * m, e * n - f * m,    # denom: c0 + Y*c1 + X*c2
        b * h - d * f, b * p - d * n, f * p - h * n,    # num_x, z^0 terms
        b * g - c * f, b * o - c * n, f * o - g * n,    # num_x, z^1 terms
        d * e - a * h, d * m - a * p, h * m - e * p,    # -num_y, z^0 (sign folded)
        c * e - a * g, c * m - a * o, g * m - e * o,    # -num_y, z^1 (sign folded)
        z0,
    ]).astype(jnp.float32)

    # ---- batch -> (rows, 128 lanes) geometry ----
    R0 = pl.cdiv(B, _LANE)                              # rows needed for B lanes
    # Rows per grid step: multiple of 8 (sublane-dense), sized to amortize the
    # per-step pipeline overhead.
    rblk = max(_SUB, (max(block_b, _LANE) // _LANE) // _SUB * _SUB)
    if R0 > _SUB:
        # Keep >= 2 grid steps for large batches (v7x has 2 TensorCores).
        rblk = min(rblk, max(_SUB, (R0 // 2) // _SUB * _SUB))
    if R0 <= rblk:
        rblk = R0                                       # single full-dim block
        R = R0
    else:
        R = pl.cdiv(R0, rblk) * rblk
    Bp = R * _LANE

    # ---- single fused relayout: [B, C] -> SoA (C, R, 128) ----
    if has_z:
        z_col = jnp.asarray(z, jnp.float32)[:, 0:1]
        inp = jnp.concatenate([xy, z_col], axis=1)      # (B, 3): Y, X, z
    else:
        inp = xy                                        # (B, 2): Y, X
    C_in = inp.shape[1]
    inp_t = jnp.pad(inp, ((0, Bp - B), (0, 0))).T.reshape(C_in, R, _LANE)

    kernel = functools.partial(_s2w_kernel, has_z=has_z)

    out_t = pl.pallas_call(
        kernel,
        out_shape=jax.ShapeDtypeStruct((3, R, _LANE), jnp.float32),
        grid_spec=pltpu.PrefetchScalarGridSpec(
            num_scalar_prefetch=1,                      # coef -> SMEM
            grid=(R // rblk,),
            in_specs=[
                pl.BlockSpec((C_in, rblk, _LANE), lambda i, coef: (0, i, 0)),
            ],
            out_specs=pl.BlockSpec((3, rblk, _LANE), lambda i, coef: (0, i, 0)),
        ),
        compiler_params=pltpu.CompilerParams(
            dimension_semantics=("parallel",),          # megacore sharding
        ),
    )(coef, inp_t)

    # Back to the module's [B, 3] output (columns x, y, z).
    # TODO(synk): if the surrounding model can consume the SoA [3, B] layout,
    # drop this transpose (and the one above) to remove the wrapper relayout.
    return out_t.reshape(3, Bp)[:, :B].T


def _reference(cam, z0, xy, z=None):
    # Direct transcription of the PyTorch forward (same evaluation order).
    cam = jnp.asarray(cam, jnp.float32)
    a, b, c, d = cam[0]
    e, f, g, h = cam[1]
    m, n, o, p = cam[3]
    X = xy[:, 1]
    Y = xy[:, 0]
    if z is None:
        zc = jnp.zeros_like(X)
    else:
        zc = z[:, 0]
    zc = zc + z0
    denom = a * f - b * e + Y * a * n - Y * b * m + X * e * n - X * f * m
    x = (b * h - d * f + Y * b * p - Y * d * n + X * f * p - X * h * n
         + b * g * zc - c * f * zc + Y * b * o * zc - Y * c * n * zc
         + X * f * o * zc - X * g * n * zc) / denom
    y = -(a * h - d * e + Y * a * p - Y * d * m + X * e * p - X * h * m
          + a * g * zc - c * e * zc + Y * a * o * zc - Y * c * m * zc
          + X * e * o * zc - X * g * m * zc) / denom
    return jnp.stack((x, y, zc), axis=1)


if __name__ == "__main__":
    key = jax.random.PRNGKey(0)
    k_cam, k_xy, k_z, k_xy2, k_z2 = jax.random.split(key, 5)

    zero_elevation = 0.5

    # Well-conditioned camera-view matrix (identity + small perturbation) so
    # the projective denominator stays bounded away from zero; screen coords
    # bounded in [-1, 1].  (An unconstrained random matrix can make the
    # denominator ~0, which blows up relative error of any re-associated
    # evaluation and makes tolerance checks meaningless.)
    cam = jnp.eye(4, dtype=jnp.float32) + 0.05 * jax.random.normal(
        k_cam, (4, 4), jnp.float32)

    # Small batch, single block, with and without z.
    B = 8
    xy = jax.random.uniform(k_xy, (B, 2), jnp.float32, minval=-1.0, maxval=1.0)
    z_in = jax.random.uniform(k_z, (B, 1), jnp.float32, minval=-0.5, maxval=0.5)

    out = jax.block_until_ready(screen_to_world(cam, zero_elevation, xy, z_in))
    ref = _reference(cam, zero_elevation, xy, z_in)
    assert out.shape == (B, 3) and out.dtype == jnp.float32
    assert jnp.allclose(out, ref, rtol=1e-4, atol=1e-5)

    out_nz = jax.block_until_ready(screen_to_world(cam, zero_elevation, xy, None))
    ref_nz = _reference(cam, zero_elevation, xy, None)
    assert out_nz.shape == (B, 3)
    assert jnp.allclose(out_nz, ref_nz, rtol=1e-4, atol=1e-5)

    # Larger, non-multiple-of-128 batch with a small block so the grid has
    # multiple steps and both lane- and row-padding paths are exercised.
    B2 = 1200
    xy2 = jax.random.uniform(k_xy2, (B2, 2), jnp.float32, minval=-1.0, maxval=1.0)
    z2 = jax.random.uniform(k_z2, (B2, 1), jnp.float32, minval=-0.5, maxval=0.5)
    out2 = jax.block_until_ready(
        screen_to_world(cam, zero_elevation, xy2, z2, block_b=1024))
    ref2 = _reference(cam, zero_elevation, xy2, z2)
    assert out2.shape == (B2, 3)
    assert jnp.allclose(out2, ref2, rtol=1e-4, atol=1e-5)

    print("KERNEL_OK")
</pallas_src>

<mosaic_0001>
module attributes {stable_mosaic.version = 11 : i64} {
  func.func @_s2w_kernel(%arg0: i32, %arg1: memref<16xf32, #tpu.memory_space<smem>>, %arg2: memref<3x1x128xf32, #tpu.memory_space<vmem>>, %arg3: memref<3x1x128xf32, #tpu.memory_space<vmem>>) attributes {dimension_semantics = [#tpu.dimension_semantics<parallel>], iteration_bounds = array<i64: 1>, scalar_prefetch = 1 : i64, scratch_operands = 0 : i64, tpu.core_type = #tpu.core_type<tc>, window_params = [{transform_indices = @transform_0, window_bounds = array<i64: 3, 1, 128>}, {transform_indices = @transform_1, window_bounds = array<i64: 3, 1, 128>}]} {
    %c0 = arith.constant 0 : index
    %c0_0 = arith.constant 0 : index
    %c0_1 = arith.constant 0 : index
    %0 = vector.load %arg2[%c0, %c0_0, %c0_1] : memref<3x1x128xf32, #tpu.memory_space<vmem>>, vector<1x1x128xf32>
    %1 = vector.shape_cast %0 : vector<1x1x128xf32> to vector<1x128xf32>
    %c1 = arith.constant 1 : index
    %c0_2 = arith.constant 0 : index
    %c0_3 = arith.constant 0 : index
    %2 = vector.load %arg2[%c1, %c0_2, %c0_3] : memref<3x1x128xf32, #tpu.memory_space<vmem>>, vector<1x1x128xf32>
    %3 = vector.shape_cast %2 : vector<1x1x128xf32> to vector<1x128xf32>
    %c0_4 = arith.constant 0 : index
    %4 = memref.load %arg1[%c0_4] : memref<16xf32, #tpu.memory_space<smem>>
    %c1_5 = arith.constant 1 : index
    %5 = memref.load %arg1[%c1_5] : memref<16xf32, #tpu.memory_space<smem>>
    %c2 = arith.constant 2 : index
    %6 = memref.load %arg1[%c2] : memref<16xf32, #tpu.memory_space<smem>>
    %c3 = arith.constant 3 : index
    %7 = memref.load %arg1[%c3] : memref<16xf32, #tpu.memory_space<smem>>
    %c4 = arith.constant 4 : index
    %8 = memref.load %arg1[%c4] : memref<16xf32, #tpu.memory_space<smem>>
    %c5 = arith.constant 5 : index
    %9 = memref.load %arg1[%c5] : memref<16xf32, #tpu.memory_space<smem>>
    %c6 = arith.constant 6 : index
    %10 = memref.load %arg1[%c6] : memref<16xf32, #tpu.memory_space<smem>>
    %c7 = arith.constant 7 : index
    %11 = memref.load %arg1[%c7] : memref<16xf32, #tpu.memory_space<smem>>
    %c8 = arith.constant 8 : index
    %12 = memref.load %arg1[%c8] : memref<16xf32, #tpu.memory_space<smem>>
    %c9 = arith.constant 9 : index
    %13 = memref.load %arg1[%c9] : memref<16xf32, #tpu.memory_space<smem>>
    %c10 = arith.constant 10 : index
    %14 = memref.load %arg1[%c10] : memref<16xf32, #tpu.memory_space<smem>>
    %c11 = arith.constant 11 : index
    %15 = memref.load %arg1[%c11] : memref<16xf32, #tpu.memory_space<smem>>
    %c12 = arith.constant 12 : index
    %16 = memref.load %arg1[%c12] : memref<16xf32, #tpu.memory_space<smem>>
    %c13 = arith.constant 13 : index
    %17 = memref.load %arg1[%c13] : memref<16xf32, #tpu.memory_space<smem>>
    %c14 = arith.constant 14 : index
    %18 = memref.load %arg1[%c14] : memref<16xf32, #tpu.memory_space<smem>>
    %c15 = arith.constant 15 : index
    %19 = memref.load %arg1[%c15] : memref<16xf32, #tpu.memory_space<smem>>
    %c2_6 = arith.constant 2 : index
    %c0_7 = arith.constant 0 : index
    %c0_8 = arith.constant 0 : index
    %20 = vector.load %arg2[%c2_6, %c0_7, %c0_8] : memref<3x1x128xf32, #tpu.memory_space<vmem>>, vector<1x1x128xf32>
    %21 = vector.shape_cast %20 : vector<1x1x128xf32> to vector<1x128xf32>
    %22 = vector.broadcast %19 : f32 to vector<1x128xf32>
    %23 = arith.addf %21, %22 : vector<1x128xf32>
    %24 = vector.broadcast %5 : f32 to vector<1x128xf32>
    %25 = arith.mulf %1, %24 : vector<1x128xf32>
    %26 = vector.broadcast %4 : f32 to vector<1x128xf32>
    %27 = arith.addf %26, %25 : vector<1x128xf32>
    %28 = vector.broadcast %6 : f32 to vector<1x128xf32>
    %29 = arith.mulf %3, %28 : vector<1x128xf32>
    %30 = arith.addf %27, %29 : vector<1x128xf32>
    %31 = tpu.reciprocal %30 {approx = true} : vector<1x128xf32> -> vector<1x128xf32>
    %32 = arith.mulf %30, %31 : vector<1x128xf32>
    %cst = arith.constant 2.000000e+00 : f32
    %33 = vector.broadcast %cst : f32 to vector<1x128xf32>
    %34 = arith.subf %33, %32 : vector<1x128xf32>
    %35 = arith.mulf %31, %34 : vector<1x128xf32>
    %36 = vector.broadcast %8 : f32 to vector<1x128xf32>
    %37 = arith.mulf %1, %36 : vector<1x128xf32>
    %38 = vector.broadcast %7 : f32 to vector<1x128xf32>
    %39 = arith.addf %38, %37 : vector<1x128xf32>
    %40 = vector.broadcast %9 : f32 to vector<1x128xf32>
    %41 = arith.mulf %3, %40 : vector<1x128xf32>
    %42 = arith.addf %39, %41 : vector<1x128xf32>
    %43 = vector.broadcast %11 : f32 to vector<1x128xf32>
    %44 = arith.mulf %1, %43 : vector<1x128xf32>
    %45 = vector.broadcast %10 : f32 to vector<1x128xf32>
    %46 = arith.addf %45, %44 : vector<1x128xf32>
    %47 = vector.broadcast %12 : f32 to vector<1x128xf32>
    %48 = arith.mulf %3, %47 : vector<1x128xf32>
    %49 = arith.addf %46, %48 : vector<1x128xf32>
    %50 = arith.mulf %23, %49 : vector<1x128xf32>
    %51 = arith.addf %42, %50 : vector<1x128xf32>
    %52 = vector.broadcast %14 : f32 to vector<1x128xf32>
    %53 = arith.mulf %1, %52 : vector<1x128xf32>
    %54 = vector.broadcast %13 : f32 to vector<1x128xf32>
    %55 = arith.addf %54, %53 : vector<1x128xf32>
    %56 = vector.broadcast %15 : f32 to vector<1x128xf32>
    %57 = arith.mulf %3, %56 : vector<1x128xf32>
    %58 = arith.addf %55, %57 : vector<1x128xf32>
    %59 = vector.broadcast %17 : f32 to vector<1x128xf32>
    %60 = arith.mulf %1, %59 : vector<1x128xf32>
    %61 = vector.broadcast %16 : f32 to vector<1x128xf32>
    %62 = arith.addf %61, %60 : vector<1x128xf32>
    %63 = vector.broadcast %18 : f32 to vector<1x128xf32>
    %64 = arith.mulf %3, %63 : vector<1x128xf32>
    %65 = arith.addf %62, %64 : vector<1x128xf32>
    %66 = arith.mulf %23, %65 : vector<1x128xf32>
    %67 = arith.addf %58, %66 : vector<1x128xf32>
    %68 = arith.mulf %51, %35 : vector<1x128xf32>
    %c0_9 = arith.constant 0 : index
    %c0_10 = arith.constant 0 : index
    %c0_11 = arith.constant 0 : index
    %69 = vector.load %arg3[%c0_9, %c0_10, %c0_11] : memref<3x1x128xf32, #tpu.memory_space<vmem>>, vector<1x1x128xf32>
    %70 = vector.shape_cast %69 : vector<1x1x128xf32> to vector<1x128xf32>
    %71 = vector.shape_cast %68 : vector<1x128xf32> to vector<1x1x128xf32>
    tpu.vector_store %arg3[%c0_9, %c0_10, %c0_11], %71 {strides = array<i32>} : memref<3x1x128xf32, #tpu.memory_space<vmem>>, vector<1x1x128xf32>,
    %72 = arith.mulf %67, %35 : vector<1x128xf32>
    %c1_12 = arith.constant 1 : index
    %c0_13 = arith.constant 0 : index
    %c0_14 = arith.constant 0 : index
    %73 = vector.load %arg3[%c1_12, %c0_13, %c0_14] : memref<3x1x128xf32, #tpu.memory_space<vmem>>, vector<1x1x128xf32>
    %74 = vector.shape_cast %73 : vector<1x1x128xf32> to vector<1x128xf32>
    %75 = vector.shape_cast %72 : vector<1x128xf32> to vector<1x1x128xf32>
    tpu.vector_store %arg3[%c1_12, %c0_13, %c0_14], %75 {strides = array<i32>} : memref<3x1x128xf32, #tpu.memory_space<vmem>>, vector<1x1x128xf32>,
    %c2_15 = arith.constant 2 : index
    %c0_16 = arith.constant 0 : index
    %c0_17 = arith.constant 0 : index
    %76 = vector.load %arg3[%c2_15, %c0_16, %c0_17] : memref<3x1x128xf32, #tpu.memory_space<vmem>>, vector<1x1x128xf32>
    %77 = vector.shape_cast %76 : vector<1x1x128xf32> to vector<1x128xf32>
    %78 = vector.shape_cast %23 : vector<1x128xf32> to vector<1x1x128xf32>
    tpu.vector_store %arg3[%c2_15, %c0_16, %c0_17], %78 {strides = array<i32>} : memref<3x1x128xf32, #tpu.memory_space<vmem>>, vector<1x1x128xf32>,
    return
  }
  func.func @transform_0(%arg0: i32, %arg1: memref<16xf32, #tpu.memory_space<smem>>) -> (i32, i32, i32) {
    %c0_i32 = arith.constant 0 : i32
    %c0_i32_0 = arith.constant 0 : i32
    %c0_i32_1 = arith.constant 0 : i32
    return %c0_i32, %arg0, %c0_i32_0 : i32, i32, i32
  }
  func.func @transform_1(%arg0: i32, %arg1: memref<16xf32, #tpu.memory_space<smem>>) -> (i32, i32, i32) {
    %c0_i32 = arith.constant 0 : i32
    %c0_i32_0 = arith.constant 0 : i32
    %c0_i32_1 = arith.constant 0 : i32
    return %c0_i32, %arg0, %c0_i32_0 : i32, i32, i32
  }
}

</mosaic_0001>

<bundles_post_ra>
// kernel: tpu_custom_call.1
= control target key start
LH: loop header
LB: loop body
LE: loop exit
PB: predicated region body
PF: predicated region fallthrough
CT: control target
= control target key end

     0   :  { %s235_s0 = inlined_call_operand.hbm [shape: f32[16], index: 0, kind: input, shape index: {}]   ;;  %s236_s1 = inlined_call_operand.vmem [shape: f32[3,1,128], index: 1, kind: input, shape index: {}]   ;;  %s237_s2 = inlined_call_operand.hbm [shape: f32[3,1,128], index: 2, kind: output, shape index: {}]  }
   0x1   :  { %s126_s11 = scalar_lea.hbm %s235_s0, 16 }
   0x2   :  { %p127_p0 = scmp.ne.s32.totalorder %s235_s0, %s126_s11  ;;  %p130_p1 = scmp.lt.u32.totalorder %s126_s11, %s235_s0 }
   0x4   :  { %p132_p2 = pnand %p130_p1, %p127_p0 }
   0x6   :  { %135 = shalt.err (!%p132_p2)  }
   0x7   :  { %s162_s16 = smov [#allocation3]  }
   0x8   :  { %8 = dma.hbm_to_smem %s235_s0, 16, %s162_s16, [#allocation2] }
   0x9   :  { %158 = dma.done.wait [#allocation2], 16 }
   0xa   :  { %159 = vsyncadd [#allocation2], 4294967280 }
   0xb   :  { %10 = sfence }
   0xc   :  { %s17_s19 = sld [smem:[#allocation3]]  ;;  %s104_s20 = sld [smem:[#allocation3 + $0x1]] }
   0xd   :  { %s105_s21 = sld [smem:[#allocation3 + $0x2]]  ;;  %s193_s22 = sld [smem:[#allocation3 + $0x4]] }
   0xe   :  { %11 = vsyncpa [#allocation5], 0  ;;  %s195_s23 = sld [smem:[#allocation3 + $0x3]]  ;;  %s197_s24 = sld [smem:[#allocation3 + $0x6]]  ;;  %v14_v0 = vld [vmem:[%s236_s1] sm:$0x1] }
   0xf   :  { %s110_s27 = sld [smem:[#allocation3 + $0x7]]  ;;  %s111_s28 = sld [smem:[#allocation3 + $0x8]]  ;;  %v103_v1 = vld [vmem:[%s236_s1 + $0x1] sm:$0x1]  ;;  %v119_v7 = vld [vmem:[%s236_s1 + $0x2] sm:$0x1] }
  0x10   :  { %s205_s30 = sld [smem:[#allocation3 + $0x5]]  ;;  %s118_s3 = sld [smem:[#allocation3 + $0xf]] }
  0x11   :  { %s207_s4 = sld [smem:[#allocation3 + $0x9]]  ;;  %s113_s5 = sld [smem:[#allocation3 + $0xa]] }
  0x12   :  { %v37_v2 = vstv %s104_s20  ;;  %v39_v3 = vstv %s17_s19  ;;  %s209_s6 = sld [smem:[#allocation3 + $0xc]]  ;;  %s116_s7 = sld [smem:[#allocation3 + $0xd]] }
  0x13   :  { %v41_v4 = vstv %s105_s21  ;;  %v38_v5 = vmul.f32 %v37_v2, %v14_v0  ;;  %s211_s8 = sld [smem:[#allocation3 + $0xb]]  ;;  %s117_s9 = sld [smem:[#allocation3 + $0xe]]  ;;  %v48_v9 = vstv %s193_s22 }
  0x14   :  { %v42_v6 = vmul.f32 %v103_v1, %v41_v4  ;;  %v57_v16 = vstv %s197_s24  ;;  %v49_v18 = vmul.f32 %v48_v9, %v14_v0  ;;  %v50_v19 = vstv %s195_s23  ;;  %s163_s1 = smov [#allocation4]  }
  0x15   :  { %v40_v8 = vadd.f32 %v39_v3, %v38_v5  ;;  %v55_v10 = vstv %s110_s27  ;;  %v59_v13 = vstv %s111_s28  ;;  %s92_s12 = sshll.u32 %s163_s1, 4  ;;  %s93_s12 = int_to_ptr.vmem [resolvable:$true] %s92_s12 }
  0x16   :  { %v35_v11 = vstv %s118_s3  ;;  %v56_v12 = vmul.f32 %v55_v10, %v14_v0  ;;  %v52_v20 = vstv %s205_s30  ;;  %v60_v21 = vmul.f32 %v103_v1, %v59_v13  ;;  %s136_s13 = scalar_lea.vmem %s93_s12, 48  ;;  %s140_s14 = scalar_lea.vmem %s93_s12, 64 }
  0x17   :  { %v36_v14 = vadd.f32 %v119_v7, %v35_v11  ;;  %v43_v15 = vadd.f32 %v42_v6, %v40_v8  ;;  %v64_v17 = vstv %s113_s5  ;;  %v66_v28 = vstv %s207_s4  ;;  %p137_p3 = scmp.ne.s32.totalorder %s93_s12, %s136_s13  ;;  %p141_p4 = scmp.lt.s32.totalorder %s93_s12, %s93_s12 }
  0x18   :  { %v71_v22 = vstv %s116_s7  ;;  %v73_v23 = vstv %s209_s6  ;;  %v58_v24 = vadd.f32 %v57_v16, %v56_v12  ;;  %v65_v25 = vmul.f32 %v64_v17, %v14_v0  ;;  %p142_p5 = scmp.lt.s32.totalorder %s140_s14, %s136_s13 }
  0x19   :  { %124 = vrcp.f32 %v43_v15  ;;  %86 = vst [vmem:[#allocation4 + $0x2] sm:$0x1] %v36_v14  ;;  %v72_v26 = vmul.f32 %v71_v22, %v14_v0  ;;  %v75_v27 = vstv %s117_s9  ;;  %v68_v29 = vstv %s211_s8 }
  0x1a   :  { %v76_v30 = vmul.f32 %v103_v1, %v75_v27  ;;  %v51_v32 = vadd.f32 %v50_v19, %v49_v18  ;;  %v53_v33 = vmul.f32 %v103_v1, %v52_v20  ;;  %v61_v34 = vadd.f32 %v60_v21, %v58_v24  ;;  %p143_p6 = por %p142_p5, %p141_p4 }
  0x1b   :  { %v74_v31 = vadd.f32 %v73_v23, %v72_v26  ;;  %v67_v35 = vadd.f32 %v66_v28, %v65_v25  ;;  %v69_v36 = vmul.f32 %v103_v1, %v68_v29 }
  0x1c   :  { %v54_v38 = vadd.f32 %v53_v33, %v51_v32  ;;  %v62_v39 = vmul.f32 %v61_v34, %v36_v14  ;;  %p144_p7 = pnand %p143_p6, %p137_p3 }
  0x1d   :  { %v77_v37 = vadd.f32 %v76_v30, %v74_v31  ;;  %v70_v40 = vadd.f32 %v69_v36, %v67_v35 }
  0x1e   :  { %v63_v45 = vadd.f32 %v62_v39, %v54_v38 }
  0x1f   :  { %v78_v41 = vmul.f32 %v77_v37, %v36_v14 }
  0x21   :  { %v79_v46 = vadd.f32 %v78_v41, %v70_v40 }
  0x23   :  { %v125_v42 = vpop.eup %124 }
  0x24   :  { %v45_v43 = vmul.f32 %v125_v42, %v43_v15 }
  0x26   :  { %v46_v44 = vsub.f32 2.0, %v45_v43 }
  0x28   :  { %v47_v47 = vmul.f32 %v125_v42, %v46_v44 }
  0x2a   :  { %v80_v48 = vmul.f32 %v63_v45, %v47_v47  ;;  %v82_v49 = vmul.f32 %v79_v46, %v47_v47 }
  0x2c   :  { %81 = vst [vmem:[#allocation4] sm:$0x1] %v80_v48  ;;  %84 = vst [vmem:[#allocation4 + $0x1] sm:$0x1] %v82_v49 }
  0x2d   :  { %147 = shalt.err (!%p144_p7)
}
  0x2e   :  { %s148_s17 = scalar_lea.hbm %s237_s2, 48 }
  0x2f   :  { %p149_p8 = scmp.ne.s32.totalorder %s237_s2, %s148_s17  ;;  %p152_p9 = scmp.lt.u32.totalorder %s148_s17, %s237_s2 }
  0x31   :  { %p154_p10 = pnand %p152_p9, %p149_p8 }
  0x33   :  { %157 = shalt.err (!%p154_p10)
}
  0x34   :  { %s164_s22 = smov 16   ;;  %s165_s23 = smov 1  }
  0x35   :  { %98 = dma.vmem_to_hbm [thread:$0]  %s93_s12, 48, %s237_s2, [#allocation5], %s164_s22, %s164_s22, %s165_s23  }
  0x36   :  { %160 = dma.done.wait [#allocation5], 48  }
  0x37   :  { %161 = vsyncadd [#allocation5], 4294967248 }
  0x38   :  { %102 = vsyncpa [#allocation5], 1 }

</bundles_post_ra>
